<compile_context>
chip_gen: v7x
topology: tpu7x:2x2x1
jax: 0.10.0
libtpu: 0.0.40
codegen_flags: <defaults>
</compile_context>

<pallas_src>
import functools

import jax
import jax.numpy as jnp
from jax.experimental import pallas as pl
from jax.experimental.pallas import tpu as pltpu


# ----------------------------------------------------------------------------
# Pass 1: trunk MLP + fused (advantage | value | zero-pad) head.
# ----------------------------------------------------------------------------
def trunk_head_kernel(x_ref,
                      w1_ref, w2_ref, w3_ref, w4_ref,   # bf16 (in, out)
                      bt_ref,                            # f32  (4, hidden) packed trunk biases
                      wh_ref,                            # bf16 (hidden, head_pad) fused head
                      bh_ref,                            # f32  (1, head_pad) fused head bias
                      y_ref):                            # f32  (tb, head_pad)
    def dense_relu(h, w_ref, b):
        # bf16 MXU inputs, f32 accumulation; bias add + ReLU stay f32 (v5e-safe).
        acc = jnp.dot(h.astype(jnp.bfloat16), w_ref[...],
                      preferred_element_type=jnp.float32)
        return jnp.maximum(acc + b, 0.0)

    h = x_ref[...]
    h = dense_relu(h, w1_ref, bt_ref[0:1, :])
    h = dense_relu(h, w2_ref, bt_ref[1:2, :])
    h = dense_relu(h, w3_ref, bt_ref[2:3, :])
    h = dense_relu(h, w4_ref, bt_ref[3:4, :])

    # One lane-dense matmul for both heads (cols [:A] = advantage, col A = value,
    # remaining cols are exact zeros from the zero-padded weights/bias).
    y_ref[...] = (jnp.dot(h.astype(jnp.bfloat16), wh_ref[...],
                          preferred_element_type=jnp.float32) + bh_ref[...])


# ----------------------------------------------------------------------------
# Pass 2: q = value + (advantage - global_mean), lane-dense padded output.
# ----------------------------------------------------------------------------
def combine_kernel(mean_ref, y_ref, q_ref, *, action_dim):
    y = y_ref[...]                                    # (tb, head_pad) f32
    val = y[:, action_dim:action_dim + 1]             # (tb, 1) value column
    m = mean_ref[0, 0]                                # SMEM scalar
    # Compute over the full padded width (unmasked store); wrapper slices [:A].
    q_ref[...] = val + (y - m)


# ----------------------------------------------------------------------------
# Wrapper
# ----------------------------------------------------------------------------
def duelling_forward(x, params, action_dim, block_batch=256):
    """x: (B, state_dim) f32.  params: see init_params.  Returns (B, action_dim) f32."""
    w1, w2, w3, w4, b_trunk, wh, bh = params
    batch, state_dim = x.shape
    hidden = w1.shape[1]
    head_pad = wh.shape[1]

    tb = min(block_batch, batch)
    assert batch % tb == 0, "batch must be a multiple of the batch tile"
    nb = batch // tb

    def resident(shape):  # weights/biases: same block every grid step -> VMEM-resident
        return pl.BlockSpec(shape, lambda i: (0, 0))

    # "parallel" batch axis: lets v7x shard tiles across its 2 TensorCores
    # (no-op on single-TC v5e/v6e).
    cparams = pltpu.CompilerParams(dimension_semantics=("parallel",))

    # ---- Pass 1: trunk + fused head, tiled over batch --------------------
    y = pl.pallas_call(
        trunk_head_kernel,
        out_shape=jax.ShapeDtypeStruct((batch, head_pad), jnp.float32),
        grid=(nb,),
        in_specs=[
            pl.BlockSpec((tb, state_dim), lambda i: (i, 0)),
            resident((state_dim, hidden)),
            resident((hidden, hidden)),
            resident((hidden, hidden)),
            resident((hidden, hidden)),
            resident((4, hidden)),
            resident((hidden, head_pad)),
            resident((1, head_pad)),
        ],
        out_specs=pl.BlockSpec((tb, head_pad), lambda i: (i, 0)),
        compiler_params=cparams,
    )(x, w1, w2, w3, w4, b_trunk, wh, bh)

    # ---- Global advantage mean (couples batch tiles -> two-pass sync point).
    # sum * compile-time reciprocal instead of a divide.
    inv = 1.0 / float(batch * action_dim)
    adv_mean = (jnp.sum(y[:, :action_dim]) * inv).reshape(1, 1)

    # ---- Pass 2: duelling combine, lane-dense output ----------------------
    q_pad = pl.pallas_call(
        functools.partial(combine_kernel, action_dim=action_dim),
        out_shape=jax.ShapeDtypeStruct((batch, head_pad), jnp.float32),
        grid=(nb,),
        in_specs=[
            pl.BlockSpec(memory_space=pltpu.MemorySpace.SMEM),   # scalar mean
            pl.BlockSpec((tb, head_pad), lambda i: (i, 0)),
        ],
        out_specs=pl.BlockSpec((tb, head_pad), lambda i: (i, 0)),
        compiler_params=cparams,
    )(adv_mean, y)

    return q_pad[:, :action_dim]


# ----------------------------------------------------------------------------
# Parameter init (PyTorch nn.Linear default: U(-1/sqrt(fan_in), 1/sqrt(fan_in))),
# packed/padded for the kernel layout.
# ----------------------------------------------------------------------------
def init_params(key, state_dim, action_dim, hidden_dim):
    head_pad = ((action_dim + 1 + 127) // 128) * 128

    def linear(k, fan_in, fan_out):
        kw, kb = jax.random.split(k)
        bound = 1.0 / (fan_in ** 0.5)
        w = jax.random.uniform(kw, (fan_in, fan_out), jnp.float32, -bound, bound)
        b = jax.random.uniform(kb, (fan_out,), jnp.float32, -bound, bound)
        return w, b

    keys = jax.random.split(key, 6)
    w1, b1 = linear(keys[0], state_dim, hidden_dim)
    w2, b2 = linear(keys[1], hidden_dim, hidden_dim)
    w3, b3 = linear(keys[2], hidden_dim, hidden_dim)
    w4, b4 = linear(keys[3], hidden_dim, hidden_dim)
    wa, ba = linear(keys[4], hidden_dim, action_dim)
    wv, bv = linear(keys[5], hidden_dim, 1)

    # Packed trunk biases (f32): one (4, hidden) array, sliced by sublane in-kernel.
    b_trunk = jnp.stack([b1, b2, b3, b4], axis=0)

    # Fused, zero-padded head: cols [:A]=advantage, col A=value, rest zero.
    wh = jnp.zeros((hidden_dim, head_pad), jnp.float32)
    wh = wh.at[:, :action_dim].set(wa)
    wh = wh.at[:, action_dim:action_dim + 1].set(wv)
    bh = jnp.zeros((1, head_pad), jnp.float32)
    bh = bh.at[0, :action_dim].set(ba)
    bh = bh.at[0, action_dim].set(bv[0])

    bf16 = lambda a: a.astype(jnp.bfloat16)
    return (bf16(w1), bf16(w2), bf16(w3), bf16(w4), b_trunk, bf16(wh), bh)


# ----------------------------------------------------------------------------
# Pure-JAX reference (identical bf16-input / f32-accumulate math) for validation.
# ----------------------------------------------------------------------------
def reference_forward(x, params, action_dim):
    w1, w2, w3, w4, b_trunk, wh, bh = params
    h = x
    for i, w in enumerate((w1, w2, w3, w4)):
        h = jnp.maximum(
            jnp.dot(h.astype(jnp.bfloat16), w, preferred_element_type=jnp.float32)
            + b_trunk[i:i + 1, :], 0.0)
    y = jnp.dot(h.astype(jnp.bfloat16), wh, preferred_element_type=jnp.float32) + bh
    adv = y[:, :action_dim]
    val = y[:, action_dim:action_dim + 1]
    return val + (adv - jnp.mean(adv))     # global mean, as in the PyTorch module


if __name__ == "__main__":
    # Small shapes consistent with the module: obs (batch, state_dim).
    batch, state_dim, action_dim, hidden_dim = 16, 16, 8, 128

    key = jax.random.PRNGKey(0)
    key, kx = jax.random.split(key)
    x = jax.random.normal(kx, (batch, state_dim), jnp.float32)
    params = init_params(key, state_dim, action_dim, hidden_dim)

    # block_batch=8 -> 2 grid steps, exercising the multi-tile (parallel) path
    # and the cross-tile global-mean handling.
    fwd = jax.jit(functools.partial(duelling_forward,
                                    action_dim=action_dim, block_batch=8))
    q = jax.block_until_ready(fwd(x, params))

    q_ref = reference_forward(x, params, action_dim)
    assert q.shape == (batch, action_dim)
    assert jnp.allclose(q, q_ref, atol=1e-4, rtol=1e-4), "mismatch vs reference"

    print("KERNEL_OK")
</pallas_src>

<mosaic_0001>
module attributes {stable_mosaic.version = 11 : i64} {
  func.func @trunk_head_kernel(%arg0: i32, %arg1: memref<8x16xf32, #tpu.memory_space<vmem>>, %arg2: memref<16x128xbf16, #tpu.memory_space<vmem>>, %arg3: memref<128x128xbf16, #tpu.memory_space<vmem>>, %arg4: memref<128x128xbf16, #tpu.memory_space<vmem>>, %arg5: memref<128x128xbf16, #tpu.memory_space<vmem>>, %arg6: memref<4x128xf32, #tpu.memory_space<vmem>>, %arg7: memref<128x128xbf16, #tpu.memory_space<vmem>>, %arg8: memref<1x128xf32, #tpu.memory_space<vmem>>, %arg9: memref<8x128xf32, #tpu.memory_space<vmem>>) attributes {dimension_semantics = [#tpu.dimension_semantics<parallel>], iteration_bounds = array<i64: 2>, scalar_prefetch = 0 : i64, scratch_operands = 0 : i64, tpu.core_type = #tpu.core_type<tc>, window_params = [{transform_indices = @transform_0, window_bounds = array<i64: 8, 16>}, {pipeline_mode = #tpu.pipeline_mode<synchronous>, transform_indices = @transform_1, window_bounds = array<i64: 16, 128>}, {pipeline_mode = #tpu.pipeline_mode<synchronous>, transform_indices = @transform_2, window_bounds = array<i64: 128, 128>}, {pipeline_mode = #tpu.pipeline_mode<synchronous>, transform_indices = @transform_3, window_bounds = array<i64: 128, 128>}, {pipeline_mode = #tpu.pipeline_mode<synchronous>, transform_indices = @transform_4, window_bounds = array<i64: 128, 128>}, {pipeline_mode = #tpu.pipeline_mode<synchronous>, transform_indices = @transform_5, window_bounds = array<i64: 4, 128>}, {pipeline_mode = #tpu.pipeline_mode<synchronous>, transform_indices = @transform_6, window_bounds = array<i64: 128, 128>}, {pipeline_mode = #tpu.pipeline_mode<synchronous>, transform_indices = @transform_7, window_bounds = array<i64: 1, 128>}, {transform_indices = @transform_8, window_bounds = array<i64: 8, 128>}]} {
    %c0 = arith.constant 0 : index
    %c0_0 = arith.constant 0 : index
    %0 = vector.load %arg1[%c0, %c0_0] : memref<8x16xf32, #tpu.memory_space<vmem>>, vector<8x16xf32>
    %c0_1 = arith.constant 0 : index
    %c0_2 = arith.constant 0 : index
    %1 = vector.load %arg6[%c0_1, %c0_2] : memref<4x128xf32, #tpu.memory_space<vmem>>, vector<1x128xf32>
    %2 = arith.truncf %0 : vector<8x16xf32> to vector<8x16xbf16>
    %c0_3 = arith.constant 0 : index
    %c0_4 = arith.constant 0 : index
    %3 = vector.load %arg2[%c0_3, %c0_4] : memref<16x128xbf16, #tpu.memory_space<vmem>>, vector<16x128xbf16>
    %cst = arith.constant dense<0.000000e+00> : vector<8x128xf32>
    %4 = tpu.matmul %2, %3, %cst {dimension_numbers = #tpu.dot_dimension_numbers<[1], [0], [0], [1], [0, 0, 1, 1], [], []>} : vector<8x16xbf16>, vector<16x128xbf16>, vector<8x128xf32> -> vector<8x128xf32>
    %5 = vector.broadcast %1 : vector<1x128xf32> to vector<8x128xf32>
    %6 = arith.addf %4, %5 : vector<8x128xf32>
    %cst_5 = arith.constant 0.000000e+00 : f32
    %7 = vector.broadcast %cst_5 : f32 to vector<8x128xf32>
    %8 = arith.maximumf %6, %7 : vector<8x128xf32>
    %c1 = arith.constant 1 : index
    %c0_6 = arith.constant 0 : index
    %9 = vector.load %arg6[%c1, %c0_6] : memref<4x128xf32, #tpu.memory_space<vmem>>, vector<1x128xf32>
    %10 = arith.truncf %8 : vector<8x128xf32> to vector<8x128xbf16>
    %c0_7 = arith.constant 0 : index
    %c0_8 = arith.constant 0 : index
    %11 = vector.load %arg3[%c0_7, %c0_8] : memref<128x128xbf16, #tpu.memory_space<vmem>>, vector<128x128xbf16>
    %cst_9 = arith.constant dense<0.000000e+00> : vector<8x128xf32>
    %12 = tpu.matmul %10, %11, %cst_9 {dimension_numbers = #tpu.dot_dimension_numbers<[1], [0], [0], [1], [0, 0, 1, 1], [], []>} : vector<8x128xbf16>, vector<128x128xbf16>, vector<8x128xf32> -> vector<8x128xf32>
    %13 = vector.broadcast %9 : vector<1x128xf32> to vector<8x128xf32>
    %14 = arith.addf %12, %13 : vector<8x128xf32>
    %cst_10 = arith.constant 0.000000e+00 : f32
    %15 = vector.broadcast %cst_10 : f32 to vector<8x128xf32>
    %16 = arith.maximumf %14, %15 : vector<8x128xf32>
    %c2 = arith.constant 2 : index
    %c0_11 = arith.constant 0 : index
    %17 = vector.load %arg6[%c2, %c0_11] : memref<4x128xf32, #tpu.memory_space<vmem>>, vector<1x128xf32>
    %18 = arith.truncf %16 : vector<8x128xf32> to vector<8x128xbf16>
    %c0_12 = arith.constant 0 : index
    %c0_13 = arith.constant 0 : index
    %19 = vector.load %arg4[%c0_12, %c0_13] : memref<128x128xbf16, #tpu.memory_space<vmem>>, vector<128x128xbf16>
    %cst_14 = arith.constant dense<0.000000e+00> : vector<8x128xf32>
    %20 = tpu.matmul %18, %19, %cst_14 {dimension_numbers = #tpu.dot_dimension_numbers<[1], [0], [0], [1], [0, 0, 1, 1], [], []>} : vector<8x128xbf16>, vector<128x128xbf16>, vector<8x128xf32> -> vector<8x128xf32>
    %21 = vector.broadcast %17 : vector<1x128xf32> to vector<8x128xf32>
    %22 = arith.addf %20, %21 : vector<8x128xf32>
    %cst_15 = arith.constant 0.000000e+00 : f32
    %23 = vector.broadcast %cst_15 : f32 to vector<8x128xf32>
    %24 = arith.maximumf %22, %23 : vector<8x128xf32>
    %c3 = arith.constant 3 : index
    %c0_16 = arith.constant 0 : index
    %25 = vector.load %arg6[%c3, %c0_16] : memref<4x128xf32, #tpu.memory_space<vmem>>, vector<1x128xf32>
    %26 = arith.truncf %24 : vector<8x128xf32> to vector<8x128xbf16>
    %c0_17 = arith.constant 0 : index
    %c0_18 = arith.constant 0 : index
    %27 = vector.load %arg5[%c0_17, %c0_18] : memref<128x128xbf16, #tpu.memory_space<vmem>>, vector<128x128xbf16>
    %cst_19 = arith.constant dense<0.000000e+00> : vector<8x128xf32>
    %28 = tpu.matmul %26, %27, %cst_19 {dimension_numbers = #tpu.dot_dimension_numbers<[1], [0], [0], [1], [0, 0, 1, 1], [], []>} : vector<8x128xbf16>, vector<128x128xbf16>, vector<8x128xf32> -> vector<8x128xf32>
    %29 = vector.broadcast %25 : vector<1x128xf32> to vector<8x128xf32>
    %30 = arith.addf %28, %29 : vector<8x128xf32>
    %cst_20 = arith.constant 0.000000e+00 : f32
    %31 = vector.broadcast %cst_20 : f32 to vector<8x128xf32>
    %32 = arith.maximumf %30, %31 : vector<8x128xf32>
    %33 = arith.truncf %32 : vector<8x128xf32> to vector<8x128xbf16>
    %c0_21 = arith.constant 0 : index
    %c0_22 = arith.constant 0 : index
    %34 = vector.load %arg7[%c0_21, %c0_22] : memref<128x128xbf16, #tpu.memory_space<vmem>>, vector<128x128xbf16>
    %cst_23 = arith.constant dense<0.000000e+00> : vector<8x128xf32>
    %35 = tpu.matmul %33, %34, %cst_23 {dimension_numbers = #tpu.dot_dimension_numbers<[1], [0], [0], [1], [0, 0, 1, 1], [], []>} : vector<8x128xbf16>, vector<128x128xbf16>, vector<8x128xf32> -> vector<8x128xf32>
    %c0_24 = arith.constant 0 : index
    %c0_25 = arith.constant 0 : index
    %36 = vector.load %arg8[%c0_24, %c0_25] : memref<1x128xf32, #tpu.memory_space<vmem>>, vector<1x128xf32>
    %37 = vector.broadcast %36 : vector<1x128xf32> to vector<8x128xf32>
    %38 = arith.addf %35, %37 : vector<8x128xf32>
    %c0_26 = arith.constant 0 : index
    %c0_27 = arith.constant 0 : index
    %39 = vector.load %arg9[%c0_26, %c0_27] : memref<8x128xf32, #tpu.memory_space<vmem>>, vector<8x128xf32>
    tpu.vector_store %arg9[%c0_26, %c0_27], %38 {strides = array<i32>} : memref<8x128xf32, #tpu.memory_space<vmem>>, vector<8x128xf32>,
    return
  }
  func.func @transform_0(%arg0: i32) -> (i32, i32) {
    %c0_i32 = arith.constant 0 : i32
    %c0_i32_0 = arith.constant 0 : i32
    return %arg0, %c0_i32 : i32, i32
  }
  func.func @transform_1(%arg0: i32) -> (i32, i32) {
    %c0_i32 = arith.constant 0 : i32
    %c0_i32_0 = arith.constant 0 : i32
    %c0_i32_1 = arith.constant 0 : i32
    return %c0_i32, %c0_i32_0 : i32, i32
  }
  func.func @transform_2(%arg0: i32) -> (i32, i32) {
    %c0_i32 = arith.constant 0 : i32
    %c0_i32_0 = arith.constant 0 : i32
    %c0_i32_1 = arith.constant 0 : i32
    return %c0_i32, %c0_i32_0 : i32, i32
  }
  func.func @transform_3(%arg0: i32) -> (i32, i32) {
    %c0_i32 = arith.constant 0 : i32
    %c0_i32_0 = arith.constant 0 : i32
    %c0_i32_1 = arith.constant 0 : i32
    return %c0_i32, %c0_i32_0 : i32, i32
  }
  func.func @transform_4(%arg0: i32) -> (i32, i32) {
    %c0_i32 = arith.constant 0 : i32
    %c0_i32_0 = arith.constant 0 : i32
    %c0_i32_1 = arith.constant 0 : i32
    return %c0_i32, %c0_i32_0 : i32, i32
  }
  func.func @transform_5(%arg0: i32) -> (i32, i32) {
    %c0_i32 = arith.constant 0 : i32
    %c0_i32_0 = arith.constant 0 : i32
    %c0_i32_1 = arith.constant 0 : i32
    return %c0_i32, %c0_i32_0 : i32, i32
  }
  func.func @transform_6(%arg0: i32) -> (i32, i32) {
    %c0_i32 = arith.constant 0 : i32
    %c0_i32_0 = arith.constant 0 : i32
    %c0_i32_1 = arith.constant 0 : i32
    return %c0_i32, %c0_i32_0 : i32, i32
  }
  func.func @transform_7(%arg0: i32) -> (i32, i32) {
    %c0_i32 = arith.constant 0 : i32
    %c0_i32_0 = arith.constant 0 : i32
    %c0_i32_1 = arith.constant 0 : i32
    return %c0_i32, %c0_i32_0 : i32, i32
  }
  func.func @transform_8(%arg0: i32) -> (i32, i32) {
    %c0_i32 = arith.constant 0 : i32
    %c0_i32_0 = arith.constant 0 : i32
    return %arg0, %c0_i32 : i32, i32
  }
}

module attributes {stable_mosaic.version = 11 : i64} {
  func.func @combine_kernel(%arg0: i32, %arg1: memref<1x1xf32, #tpu.memory_space<smem>>, %arg2: memref<8x128xf32, #tpu.memory_space<vmem>>, %arg3: memref<8x128xf32, #tpu.memory_space<vmem>>) attributes {dimension_semantics = [#tpu.dimension_semantics<parallel>], iteration_bounds = array<i64: 2>, scalar_prefetch = 0 : i64, scratch_operands = 0 : i64, tpu.core_type = #tpu.core_type<tc>, window_params = [{transform_indices = @transform_0, window_bounds = array<i64: 1, 1>}, {transform_indices = @transform_1, window_bounds = array<i64: 8, 128>}, {transform_indices = @transform_2, window_bounds = array<i64: 8, 128>}]} {
    %c0 = arith.constant 0 : index
    %c0_0 = arith.constant 0 : index
    %0 = vector.load %arg2[%c0, %c0_0] : memref<8x128xf32, #tpu.memory_space<vmem>>, vector<8x128xf32>
    %1 = vector.extract_strided_slice %0 {offsets = [0, 8], sizes = [8, 1], strides = [1, 1]} : vector<8x128xf32> to vector<8x1xf32>
    %c0_1 = arith.constant 0 : index
    %c0_2 = arith.constant 0 : index
    %2 = memref.load %arg1[%c0_1, %c0_2] : memref<1x1xf32, #tpu.memory_space<smem>>
    %3 = vector.broadcast %2 : f32 to vector<8x128xf32>
    %4 = arith.subf %0, %3 : vector<8x128xf32>
    %5 = vector.broadcast %1 : vector<8x1xf32> to vector<8x128xf32>
    %6 = arith.addf %5, %4 : vector<8x128xf32>
    %c0_3 = arith.constant 0 : index
    %c0_4 = arith.constant 0 : index
    %7 = vector.load %arg3[%c0_3, %c0_4] : memref<8x128xf32, #tpu.memory_space<vmem>>, vector<8x128xf32>
    tpu.vector_store %arg3[%c0_3, %c0_4], %6 {strides = array<i32>} : memref<8x128xf32, #tpu.memory_space<vmem>>, vector<8x128xf32>,
    return
  }
  func.func @transform_0(%arg0: i32) -> (i32, i32) {
    %c0_i32 = arith.constant 0 : i32
    %c0_i32_0 = arith.constant 0 : i32
    %c0_i32_1 = arith.constant 0 : i32
    return %c0_i32, %c0_i32_0 : i32, i32
  }
  func.func @transform_1(%arg0: i32) -> (i32, i32) {
    %c0_i32 = arith.constant 0 : i32
    %c0_i32_0 = arith.constant 0 : i32
    return %arg0, %c0_i32 : i32, i32
  }
  func.func @transform_2(%arg0: i32) -> (i32, i32) {
    %c0_i32 = arith.constant 0 : i32
    %c0_i32_0 = arith.constant 0 : i32
    return %arg0, %c0_i32 : i32, i32
  }
}

</mosaic_0001>

<bundles_post_ra>
// kernel: duelling_forward.3
= control target key start
LH: loop header
LB: loop body
LE: loop exit
PB: predicated region body
PF: predicated region fallthrough
CT: control target
= control target key end

     0   :  { %s227_s11 = smov 0   ;;  %s256_s0 = inlined_call_operand.<no memory space> [shape: f32[1,1], index: 0, kind: input, shape index: {}]   ;;  %s257_s1 = inlined_call_operand.vmem [shape: f32[16,128], index: 1, kind: input, shape index: {}]   ;;  %s258_s2 = inlined_call_operand.vmem [shape: f32[16,128], index: 2, kind: output, shape index: {}]  }
   0x1   :  { %7 = sst [smem:[#allocation2]] %s256_s0 }
   0x2 LB: > { %s204_s12 = sadd.s32 4294967295, %s229_s11   ;;  %p208_p0 = scmp.ge.s32.totalorder %s229_s11, 1  ;;  %s229_s11 = sphi %s227_s11, %s13_s11  }
   0x3   : > { %p112_p1 = scmp.lt.s32.totalorder %s229_s11, 3 }
   0x5   : > { %p113_p2 = pnand %p208_p0, %p112_p1 }
   0x6   : > { %p132_p3 = scmp.lt.s32.totalorder (!%p113_p2), %s204_s12, 1  ;;  %v231_v0 = vmov (!%p113_p2), 8   ;;  %s141_s0 = sld [smem:[#allocation2]] (!%p113_p2) }
   0x7   : > { %116 = sbr.rel (%p113_p2) target bundleno = 149 (0x95), region = 28  ;;  %222 = vset.pattern.permute.xlu0 (!%p113_p2), %v231_v0 }
   0xc   : > { %v142_v2 = vstv (!%p113_p2), %s141_s0 }
   0xe   : > { %s260_s12 = smov (!%p132_p3, %s204_s12), 1 }
   0xf   : > { %s209_s13 = sshll.u32 %s260_s12, 3 }
  0x10   : > { %s135_s16 = scalar_lea.vmem %s257_s1, %s209_s13  ;;  %s139_s19 = scalar_lea.vmem %s258_s2, %s209_s13 }
  0x11   : > { %v140_v1 = vld [vmem:[%s135_s16] sm:$0xff] }
  0x12   : > { %146 = vperm.xlu0 %222, %v140_v1   ;;  %v143_v3 = vsub.f32 %v140_v1, %v142_v2 }
  0x91   : > { %v147_v4 = vpop.permute.xlu0 %146 }
  0x92   : > { %v149_v5 = vadd.f32 %v147_v4, %v143_v3 }
  0x94   : > { %150 = vst [vmem:[%s139_s19] sm:$0xff] %v149_v5 }
  0x95 PF: > { %s13_s11 = sadd.s32 1, %s229_s11  }
  0x96   : > { %p10_p4 = scmp.ge.s32.totalorder %s13_s11, 4  }
  0x98   :  { %12 = sbr.rel (!%p10_p4) target bundleno = 2 (0x2), region = 58 }

// kernel: duelling_forward.2
= control target key start
LH: loop header
LB: loop body
LE: loop exit
PB: predicated region body
PF: predicated region fallthrough
CT: control target
= control target key end

     0   :  { %s1921_s0 = inlined_call_operand.hbm [shape: f32[16,16], index: 0, kind: input, shape index: {}]   ;;  %s1922_s1 = inlined_call_operand.hbm [shape: bf16[16,128], index: 1, kind: input, shape index: {}]   ;;  %s1923_s2 = inlined_call_operand.hbm [shape: bf16[128,128], index: 2, kind: input, shape index: {}]   ;;  %s1924_s3 = inlined_call_operand.hbm [shape: bf16[128,128], index: 3, kind: input, shape index: {}]   ;;  %s1925_s4 = inlined_call_operand.hbm [shape: bf16[128,128], index: 4, kind: input, shape index: {}]   ;;  %s1926_s5 = inlined_call_operand.vmem [shape: f32[4,128], index: 5, kind: input, shape index: {}]   ;;  %s1927_s6 = inlined_call_operand.hbm [shape: bf16[128,128], index: 6, kind: input, shape index: {}]   ;;  %s1928_s7 = inlined_call_operand.vmem [shape: f32[1,128], index: 7, kind: input, shape index: {}]   ;;  %s1929_s8 = inlined_call_operand.vmem [shape: f32[16,128], index: 8, kind: output, shape index: {}]  }
   0x1   :  { %1932 = sst [smem:[#allocation16_spill]] %s1922_s1 }
   0x2   :  { %13 = vsyncpa [#allocation3], 0 }
   0x3   :  { %15 = vsyncpa [#allocation3 + $0x1], 0 }
   0x4   :  { %16 = vsyncpa [#allocation5], 0 }
   0x5   :  { %17 = vsyncpa [#allocation8], 0 }
   0x6   :  { %18 = vsyncpa [#allocation11], 0  ;;  %s1597_s27 = smov 0   ;;  %s1599_s28 = smov 0  }
   0x7   :  { %s1601_s29 = smov 0   ;;  %s1603_s30 = smov 0  }
   0x8 LB: > { %s1542_s9 = smov [#allocation4]   ;;  %s1618_s11 = sadd.s32 4294967295, %s1540_s30   ;;  %s1540_s30 = sphi %s1603_s30, %s1950_s30   ;;  %s1536_s29 = sphi %s1601_s29, %s1949_s29   ;;  %s1532_s28 = sphi %s1599_s28, %s1948_s28   ;;  %s1528_s27 = sphi %s1597_s27, %s1947_s27  }
   0x9   : > { %s240_s10 = sshll.u32 %s1542_s9, 4  ;;  %p1015_p0 = scmp.ge.s32.totalorder %s1540_s30, 1  ;;  %s1623_s10 = int_to_ptr.vmem [resolvable:$true] %s240_s10 }
   0xa   : > { %p1930_p1 = scmp.eq.s32.totalorder %s1618_s11, 0  ;;  %p228_p2 = scmp.lt.s32.totalorder %s1540_s30, 3 }
   0xb   : > { %s1543_s13 = smov [#allocation7]   ;;  %s1544_s16 = smov [#allocation6]  }
   0xc   : > { %p1625_p3 = pnand %p1015_p0, %p228_p2  ;;  %s266_s14 = sshll.u32 %s1543_s13, 4  ;;  %s1637_s14 = int_to_ptr.vmem [resolvable:$true] %s266_s14 }
   0xd   : > { %s253_s17 = sshll.u32 %s1544_s16, 4  ;;  %s1935_s1 = sld [smem:[#allocation16_spill]]  ;;  %s1639_s17 = int_to_ptr.vmem [resolvable:$true] %s253_s17 }
   0xe   : > { %s1933_s12 = scalar_select %p1625_p3, 1, 0 }
   0xf   : > { %p1219_p4 = pneg %p1625_p3 }
  0x11   : > { %p1633_p5 = pnand %p1219_p4, %p1930_p1 }
  0x13   : > { %s1324_s20 = scalar_lea.hbm %s1935_s1, 128  ;;  %p1649_p7 = pneg %p1633_p5 }
  0x14   : > { %p1325_p6 = scmp.ne.s32.totalorder %s1935_s1, %s1324_s20  ;;  %p1331_p10 = scmp.lt.u32.totalorder %s1324_s20, %s1935_s1 }
  0x16   : > { %p1327_p8 = pnand %p1649_p7, %p1325_p6 }
  0x18   : > { %p1328_p9 = pneg %p1327_p8 }
  0x1a   : > { %p1333_p11 = pnand %p1331_p10, %p1328_p9 }
  0x1c   : > { %1336 = shalt.err (!%p1333_p11)
}
  0x1d   : > { %s1337_s26 = scalar_lea.vmem %s1623_s10, 128  ;;  %p1345_p2 = scmp.lt.s32.totalorder %s1623_s10, %s1623_s10 }
  0x1e   : > { %p1338_p12 = scmp.ne.s32.totalorder %s1623_s10, %s1337_s26  ;;  %p1346_p4 = scmp.lt.s32.totalorder %s1337_s26, %s1337_s26 }
  0x20   : > { %p1340_p13 = pnand %p1338_p12, %p1649_p7  ;;  %p1347_p6 = por %p1346_p4, %p1345_p2 }
  0x22   : > { %p1341_p0 = pneg %p1340_p13 }
  0x24   : > { %p1348_p8 = pnand %p1347_p6, %p1341_p0 }
  0x26   : > { %1351 = shalt.err (!%p1348_p8)
}
  0x27   : > { %s1545_s9 = smov 64   ;;  %s1546_s13 = smov 4  }
  0x28   : > { %1222 = dma.hbm_to_vmem [thread:$0]  (!%p1633_p5), %s1935_s1, 128, %s1623_s10, [#allocation5], %s1545_s9, %s1545_s9, %s1546_s13  }
  0x29   : > { %s1352_s21 = scalar_lea.hbm %s1924_s3, 1024 }
  0x2a   : > { %p1353_p9 = scmp.ne.s32.totalorder %s1924_s3, %s1352_s21  ;;  %p1359_p12 = scmp.lt.u32.totalorder %s1352_s21, %s1924_s3 }
  0x2c   : > { %p1355_p10 = pnand %p1353_p9, %p1649_p7 }
  0x2e   : > { %p1356_p11 = pneg %p1355_p10 }
  0x30   : > { %p1361_p13 = pnand %p1359_p12, %p1356_p11 }
  0x32   : > { %1364 = shalt.err (!%p1361_p13)
}
  0x33   : > { %s1365_s10 = scalar_lea.vmem %s1637_s14, 1024  ;;  %p1373_p6 = scmp.lt.s32.totalorder %s1637_s14, %s1637_s14 }
  0x34   : > { %p1366_p0 = scmp.ne.s32.totalorder %s1637_s14, %s1365_s10  ;;  %p1374_p8 = scmp.lt.s32.totalorder %s1365_s10, %s1365_s10 }
  0x36   : > { %p1368_p2 = pnand %p1366_p0, %p1649_p7  ;;  %p1375_p9 = por %p1374_p8, %p1373_p6 }
  0x38   : > { %p1369_p4 = pneg %p1368_p2 }
  0x3a   : > { %p1376_p10 = pnand %p1375_p9, %p1369_p4 }
  0x3c   : > { %1379 = shalt.err (!%p1376_p10)
}
  0x3d   : > { %1228 = dma.hbm_to_vmem [thread:$0]  (!%p1633_p5), %s1924_s3, 1024, %s1637_s14, [#allocation8], %s1545_s9, %s1545_s9, %s1546_s13  }
  0x3e   : > { %s1380_s21 = scalar_lea.hbm %s1923_s2, 1024 }
  0x3f   : > { %p1381_p11 = scmp.ne.s32.totalorder %s1923_s2, %s1380_s21  ;;  %p1387_p0 = scmp.lt.u32.totalorder %s1380_s21, %s1923_s2 }
  0x41   : > { %p1383_p12 = pnand %p1381_p11, %p1649_p7 }
  0x43   : > { %p1384_p13 = pneg %p1383_p12 }
  0x45   : > { %p1389_p2 = pnand %p1387_p0, %p1384_p13 }
  0x47   : > { %1392 = shalt.err (!%p1389_p2)
}
  0x48   : > { %s1393_s14 = scalar_lea.vmem %s1639_s17, 1024  ;;  %p1401_p9 = scmp.lt.s32.totalorder %s1639_s17, %s1639_s17 }
  0x49   : > { %p1394_p4 = scmp.ne.s32.totalorder %s1639_s17, %s1393_s14  ;;  %p1402_p10 = scmp.lt.s32.totalorder %s1393_s14, %s1393_s14 }
  0x4b   : > { %p1396_p6 = pnand %p1394_p4, %p1649_p7  ;;  %p1403_p11 = por %p1402_p10, %p1401_p9 }
  0x4d   : > { %p1397_p8 = pneg %p1396_p6 }
  0x4f   : > { %p1404_p12 = pnand %p1403_p11, %p1397_p8 }
  0x51   : > { %1407 = shalt.err (!%p1404_p12)
}
  0x52   : > { %1225 = dma.hbm_to_vmem [thread:$0]  (!%p1633_p5), %s1923_s2, 1024, %s1639_s17, [#allocation5], %s1545_s9, %s1545_s9, %s1546_s13  }
  0x53   : > { %s1547_s18 = smov [#allocation9]   ;;  %s1548_s20 = smov [#allocation10]  }
  0x54   : > { %s279_s19 = sshll.u32 %s1547_s18, 4  ;;  %s295_s21 = sshll.u32 %s1548_s20, 4  ;;  %s280_s19 = int_to_ptr.vmem [resolvable:$true] %s279_s19  ;;  %s296_s21 = int_to_ptr.vmem [resolvable:$true] %s295_s21 }
  0x55   : > { %s1408_s25 = scalar_lea.hbm %s1925_s4, 1024 }
  0x56   : > { %p1409_p13 = scmp.ne.s32.totalorder %s1925_s4, %s1408_s25  ;;  %p1415_p4 = scmp.lt.u32.totalorder %s1408_s25, %s1925_s4 }
  0x58   : > { %p1411_p0 = pnand %p1409_p13, %p1649_p7 }
  0x5a   : > { %p1412_p2 = pneg %p1411_p0 }
  0x5c   : > { %p1417_p6 = pnand %p1415_p4, %p1412_p2 }
  0x5e   : > { %1420 = shalt.err (!%p1417_p6)
}
  0x5f   : > { %s1421_s17 = scalar_lea.vmem %s280_s19, 1024  ;;  %p1429_p11 = scmp.lt.s32.totalorder %s280_s19, %s280_s19 }
  0x60   : > { %p1422_p8 = scmp.ne.s32.totalorder %s280_s19, %s1421_s17  ;;  %p1430_p12 = scmp.lt.s32.totalorder %s1421_s17, %s1421_s17 }
  0x62   : > { %p1424_p9 = pnand %p1422_p8, %p1649_p7  ;;  %p1431_p1 = por %p1430_p12, %p1429_p11 }
  0x64   : > { %p1425_p10 = pneg %p1424_p9 }
  0x66   : > { %p1432_p3 = pnand %p1431_p1, %p1425_p10 }
  0x68   : > { %1435 = shalt.err (!%p1432_p3)
}
  0x69   : > { %1231 = dma.hbm_to_vmem [thread:$0]  (!%p1633_p5), %s1925_s4, 1024, %s280_s19, [#allocation8], %s1545_s9, %s1545_s9, %s1546_s13  }
  0x6a   : > { %s1436_s22 = scalar_lea.hbm %s1927_s6, 1024 }
  0x6b   : > { %p1437_p1 = scmp.ne.s32.totalorder %s1927_s6, %s1436_s22  ;;  %p1443_p0 = scmp.lt.u32.totalorder %s1436_s22, %s1927_s6 }
  0x6d   : > { %p1439_p3 = pnand %p1437_p1, %p1649_p7 }
  0x6f   : > { %p1440_p13 = pneg %p1439_p3 }
  0x71   : > { %p1445_p2 = pnand %p1443_p0, %p1440_p13 }
  0x73   : > { %1448 = shalt.err (!%p1445_p2)
}
  0x74   : > { %s1449_s10 = scalar_lea.vmem %s296_s21, 1024  ;;  %p1457_p9 = scmp.lt.s32.totalorder %s296_s21, %s296_s21 }
  0x75   : > { %p1450_p4 = scmp.ne.s32.totalorder %s296_s21, %s1449_s10  ;;  %p1458_p10 = scmp.lt.s32.totalorder %s1449_s10, %s1449_s10 }
  0x77   : > { %p1452_p6 = pnand %p1450_p4, %p1649_p7  ;;  %p1459_p11 = por %p1458_p10, %p1457_p9 }
  0x79   : > { %p1453_p8 = pneg %p1452_p6 }
  0x7b   : > { %p1460_p12 = pnand %p1459_p11, %p1453_p8 }
  0x7d   : > { %1463 = shalt.err (!%p1460_p12)
}
  0x7e   : > { %1234 = dma.hbm_to_vmem [thread:$0]  (!%p1633_p5), %s1927_s6, 1024, %s296_s21, [#allocation11], %s1545_s9, %s1545_s9, %s1546_s13  }
  0x7f   : > { %s1768_s15 = sadd.s32 1, %s1540_s30   ;;  %s31_s1 = sadd.s32 1, %s1536_s29 }
  0x80   : > { %s28_s23 = ssub.s32 %s1540_s30, %s1768_s15  ;;  %p38_p1 = scmp.ne.s32.totalorder %s1536_s29, %s1532_s28 }
  0x81   : > { %p29_p7 = scmp.eq.s32.totalorder %s28_s23, 0  ;;  %p39_p3 = scmp.eq.s32.totalorder %s1540_s30, 0 }
  0x82   : > { %p44_p13 = scmp.ne.s32.totalorder %s1532_s28, %s1528_s27  ;;  %p1937_p2 = scmp.eq.s32.totalorder %s1618_s11, 0 }
  0x83   : > { %s1779_s16 = scalar_select %p29_p7, %s1536_s29, %s31_s1  }
  0x84   : > { %p40_p0 = por %p39_p3, %p38_p1  ;;  %p1783_p4 = por %p1937_p2, %p44_p13 }
  0x85   : > { %p1244_p6 = scmp.lt.s32.totalorder %s1540_s30, 2  ;;  %s312_s20 = sand.u32 1, %s1536_s29  }
  0x86   : > { %s1022_s9 = sshll.u32 %s312_s20, 3  ;;  %s1023_s13 = sshll.u32 %s1540_s30, 7 }
  0x87   : > { %s1793_s24 = scalar_lea.hbm %s1921_s0, %s1023_s13  ;;  %s316_s27 = scalar_lea.vmem [#allocation2], %s1022_s9 }
  0x88   : > { %s323_s25 = sshll.u32 %s316_s27, 4  ;;  %p1797_p5 = pnand %p1244_p6, %p40_p0  ;;  %s1795_s25 = int_to_ptr.vmem [resolvable:$true] %s323_s25 }
  0x89   : > { %s313_s30 = scalar_lea.sflag [#allocation3], %s312_s20  ;;  %s1464_s14 = scalar_lea.hbm %s1793_s24, 128 }
  0x8a   : > { %p1465_p8 = scmp.ne.s32.totalorder %s1793_s24, %s1464_s14  ;;  %p1466_p9 = pneg %p1797_p5 }
  0x8b   : > { %s1469_s17 = scalar_lea.hbm %s1921_s0, 256  ;;  %p1470_p12 = scmp.lt.u32.totalorder %s1793_s24, %s1921_s0 }
  0x8c   : > { %p1467_p10 = pnand %p1466_p9, %p1465_p8  ;;  %p1471_p7 = scmp.lt.u32.totalorder %s1469_s17, %s1464_s14 }
  0x8d   : > { %p1473_p3 = scmp.lt.u32.totalorder %s1464_s14, %s1793_s24 }
  0x8e   : > { %p1468_p11 = pneg %p1467_p10  ;;  %p1472_p1 = por %p1471_p7, %p1470_p12 }
  0x90   : > { %p1474_p13 = por %p1473_p3, %p1472_p1 }
  0x92   : > { %p1475_p0 = pnand %p1474_p13, %p1468_p11 }
  0x94   : > { %1478 = shalt.err (!%p1475_p0)
}
  0x95   : > { %s1479_s20 = scalar_lea.vmem %s1795_s25, 128  ;;  %s1549_s9 = smov [#allocation2]  }
  0x96   : > { %p1480_p2 = scmp.ne.s32.totalorder %s1795_s25, %s1479_s20  ;;  %s1484_s13 = sshll.u32 %s1549_s9, 4  ;;  %s1485_s13 = int_to_ptr.vmem [resolvable:$false] %s1484_s13 }
  0x97   : > { %s1486_s21 = scalar_lea.vmem %s1485_s13, 256  ;;  %p1487_p10 = scmp.lt.s32.totalorder %s1795_s25, %s1485_s13 }
  0x98   : > { %p1482_p6 = pnand %p1480_p2, %p1466_p9  ;;  %p1488_p12 = scmp.lt.s32.totalorder %s1486_s21, %s1479_s20 }
  0x9a   : > { %p1483_p8 = pneg %p1482_p6  ;;  %p1489_p7 = por %p1488_p12, %p1487_p10 }
  0x9c   : > { %p1490_p1 = pnand %p1489_p7, %p1483_p8 }
  0x9e   : > { %1493 = shalt.err (!%p1490_p1)
}
  0x9f   : > { %1238 = dma.hbm_to_vmem [thread:$0]  (!%p1797_p5), %s1793_s24, 128, %s1795_s25, %s313_s30  }
  0xa0   : > { %p1940_p11 = scmp.ne.s32.totalorder %s1933_s12, 0 }
  0xa1   : > { %s334_s22 = sand.u32 (!%p1940_p11), 1, %s1532_s28  }
  0xa2   : > { %332 = sbr.rel (%p1940_p11) target bundleno = 1273 (0x4f9), region = 52  ;;  %s1025_s27 = sshll.u32 (!%p1940_p11), %s334_s22, 3 }
  0xa3   : > { %s335_s14 = scalar_lea.sflag (!%p1940_p11), [#allocation3], %s334_s22  ;;  %s338_s10 = scalar_lea.vmem (!%p1940_p11), [#allocation2], %s1025_s27 }
  0xa9   : > { %1511 = dma.done.wait (%p1783_p4), %s335_s14, 128  }
  0xaa   : > { %1513 = vsyncadd (%p1783_p4), %s335_s14, 4294967168  ;;  %p1941_p9 = scmp.eq.s32.totalorder %s1618_s11, 0 }
  0xac   : > { %1515 = dma.done.wait (%p1941_p9), [#allocation5], 1152   ;;  %p1942_p3 = pmov %p1941_p9 }
  0xae   : > { %1517 = vsyncadd (%p1942_p3), [#allocation5], 4294966144  ;;  %p1943_p5 = pmov %p1942_p3 }
  0xaf   : > { %p1944_p13 = pmov %p1942_p3 }
  0xb0   : > { %1519 = dma.done.wait (%p1943_p5), [#allocation8], 2048  }
  0xb1   : > { %1521 = vsyncadd (%p1944_p13), [#allocation8], 4294965248  ;;  %p1945_p0 = pmov %p1942_p3 }
  0xb3   : > { %1523 = dma.done.wait (%p1945_p0), [#allocation11], 1024   ;;  %p1946_p2 = pmov %p1945_p0 }
  0xb4   : > { %v1550_v0 = vmov 0.0   ;;  %vm1551_vm0 = vmmov 0   ;;  %v1291_v1 = vld [vmem:[#allocation4] sm:$0xff]   ;;  %v395_v2 = vld [vmem:[%s338_s10] sm:$0xff]  ;;  %vm410_vm1 = vcmask 130048   ;;  %v1292_v4 = vld [vmem:[#allocation6] sm:$0xff]  }
  0xb5   : > { %1525 = vsyncadd (%p1946_p2), [#allocation11], 4294966272  ;;  %1111 = vmatprep.subr.bf16.mxu0 %v1550_v0  ;;  %1113 = vmatprep.mubr.msk.bf16.mxu0 %vm1551_vm0, %v1550_v0  ;;  %v397_v3 = vpack.c.bf16 %v395_v2, %v395_v2  ;;  %v1293_v5 = vld [vmem:[#allocation6 + $0x8] sm:$0xff]   ;;  %v1294_v6 = vld [vmem:[#allocation6 + $0x10] sm:$0xff]   ;;  %p390_p4 = scmp.lt.s32.totalorder %s1618_s11, 1 }
  0xb6   : > { %1117 = vmatprep.subr.bf16.mxu1 %v1550_v0  ;;  %1133 = vmatprep.mubr.msk.bf16.mxu1 %vm1551_vm0, %v1550_v0  ;;  %v1295_v7 = vld [vmem:[#allocation6 + $0x18] sm:$0xff]   ;;  %v1296_v8 = vld [vmem:[#allocation6 + $0x20] sm:$0xff]   ;;  %v1297_v9 = vld [vmem:[#allocation6 + $0x28] sm:$0xff]  }
  0xb7   : > { %1112 = vmatpush3.bf16.msra.mxu0 %v1291_v1  ;;  %1118 = vmatpush3.bf16.msra.mxu1 %v1292_v4  ;;  %v1298_v10 = vld [vmem:[#allocation6 + $0x30] sm:$0xff]   ;;  %v1299_v11 = vld [vmem:[#allocation6 + $0x38] sm:$0xff]   ;;  %v1300_v12 = vld [vmem:[#allocation7] sm:$0xff]   ;;  %s1952_s11 = smov (!%p390_p4, %s1618_s11), 1 }
  0xb8   : > { %1137 = vmatprep.subr.bf16.mxu0 %v1550_v0  ;;  %1119 = vmatprep.subr.bf16.mxu1 %v1550_v0  ;;  %v1301_v13 = vld [vmem:[#allocation7 + $0x8] sm:$0xff]   ;;  %v1302_v14 = vld [vmem:[#allocation7 + $0x10] sm:$0xff]   ;;  %v1303_v15 = vld [vmem:[#allocation7 + $0x18] sm:$0xff]   ;;  %s1031_s23 = sshll.u32 %s1952_s11, 3 }
  0xb9   : > { %v1304_v16 = vld [vmem:[#allocation7 + $0x20] sm:$0xff]   ;;  %v1305_v17 = vld [vmem:[#allocation7 + $0x28] sm:$0xff]   ;;  %v1306_v26 = vld [vmem:[#allocation7 + $0x30] sm:$0xff]   ;;  %s393_s21 = scalar_lea.vmem %s1929_s8, %s1031_s23 }
  0xba   : > { %1114 = vmatmul.mubr.msk.bf16.vlgmr.msra.gmra.mrb[0].mxu0 %vm410_vm1, %v397_v3  ;;  %v1032_v18 = vld [vmem:[%s1926_s5] ss:$0 sm:$0xff]  ;;  %v1307_v27 = vld [vmem:[#allocation7 + $0x38] sm:$0xff]   ;;  %v1308_v28 = vld [vmem:[#allocation9] sm:$0xff]  }
  0xbb   : > { %1153 = vmatprep.mubr.msk.bf16.mxu0 %vm1551_vm0, %v1550_v0  ;;  %1120 = vmatpush3.bf16.msra.mxu1 %v1293_v5  ;;  %v1309_v29 = vld [vmem:[#allocation9 + $0x8] sm:$0xff]   ;;  %v1310_v30 = vld [vmem:[#allocation9 + $0x10] sm:$0xff]   ;;  %v1311_v31 = vld [vmem:[#allocation9 + $0x18] sm:$0xff]  }
  0xbc   : > { %1121 = vmatprep.subr.bf16.mxu1 %v1550_v0  ;;  %1138 = vmatpush3.bf16.msra.mxu0 %v1300_v12  ;;  %v1312_v32 = vld [vmem:[#allocation9 + $0x20] sm:$0xff]   ;;  %v1313_v33 = vld [vmem:[#allocation9 + $0x28] sm:$0xff]   ;;  %v1314_v42 = vld [vmem:[#allocation9 + $0x30] sm:$0xff]  }
  0xbd   : > { %1139 = vmatprep.subr.bf16.mxu0 %v1550_v0  ;;  %v1035_v34 = vld [vmem:[%s1926_s5 + $0x1] ss:$0 sm:$0xff]  ;;  %v1315_v43 = vld [vmem:[#allocation9 + $0x38] sm:$0xff]   ;;  %v1316_v44 = vld [vmem:[#allocation10] sm:$0xff]  }
  0xbe   : > { %v1317_v45 = vld [vmem:[#allocation10 + $0x8] sm:$0xff]   ;;  %v1318_v46 = vld [vmem:[#allocation10 + $0x10] sm:$0xff]   ;;  %v1319_v47 = vld [vmem:[#allocation10 + $0x18] sm:$0xff]  }
  0xbf   : > { %1122 = vmatpush3.bf16.msra.mxu1 %v1294_v6  ;;  %v1320_v48 = vld [vmem:[#allocation10 + $0x20] sm:$0xff]   ;;  %v1321_v49 = vld [vmem:[#allocation10 + $0x28] sm:$0xff]   ;;  %v1322_v58 = vld [vmem:[#allocation10 + $0x30] sm:$0xff]  }
  0xc0   : > { %1123 = vmatprep.subr.bf16.mxu1 %v1550_v0  ;;  %1140 = vmatpush3.bf16.msra.mxu0 %v1301_v13  ;;  %v1044_v50 = vld [vmem:[%s1926_s5 + $0x2] ss:$0 sm:$0xff]  ;;  %v1323_v59 = vld [vmem:[#allocation10 + $0x38] sm:$0xff]   ;;  %v1053_v60 = vld [vmem:[%s1926_s5 + $0x3] ss:$0 sm:$0xff] }
  0xc1   : > { %1141 = vmatprep.subr.bf16.mxu0 %v1550_v0 }
  0xc3   : > { %1124 = vmatpush3.bf16.msra.mxu1 %v1295_v7 }
  0xc4   : > { %1125 = vmatprep.subr.bf16.mxu1 %v1550_v0  ;;  %1142 = vmatpush3.bf16.msra.mxu0 %v1302_v14 }
  0xc5   : > { %1143 = vmatprep.subr.bf16.mxu0 %v1550_v0 }
  0xc7   : > { %1126 = vmatpush3.bf16.msra.mxu1 %v1296_v8 }
  0xc8   : > { %1127 = vmatprep.subr.bf16.mxu1 %v1550_v0  ;;  %1144 = vmatpush3.bf16.msra.mxu0 %v1303_v15 }
  0xc9   : > { %1145 = vmatprep.subr.bf16.mxu0 %v1550_v0 }
  0xcb   : > { %1128 = vmatpush3.bf16.msra.mxu1 %v1297_v9 }
  0xcc   : > { %1129 = vmatprep.subr.bf16.mxu1 %v1550_v0  ;;  %1146 = vmatpush3.bf16.msra.mxu0 %v1304_v16 }
  0xcd   : > { %1147 = vmatprep.subr.bf16.mxu0 %v1550_v0 }
  0xcf   : > { %1130 = vmatpush3.bf16.msra.mxu1 %v1298_v10 }
  0xd0   : > { %1131 = vmatprep.subr.bf16.mxu1 %v1550_v0  ;;  %1148 = vmatpush3.bf16.msra.mxu0 %v1305_v17 }
  0xd1   : > { %1149 = vmatprep.subr.bf16.mxu0 %v1550_v0 }
  0xd3   : > { %1132 = vmatpush3.bf16.msra.mxu1 %v1299_v11 }
  0xd4   : > { %1157 = vmatprep.subr.bf16.mxu1 %v1550_v0  ;;  %1150 = vmatpush3.bf16.msra.mxu0 %v1306_v26 }
  0xd5   : > { %1151 = vmatprep.subr.bf16.mxu0 %v1550_v0 }
  0xd8   : > { %1152 = vmatpush3.bf16.msra.mxu0 %v1307_v27 }
  0xd9   : > { %1177 = vmatprep.subr.bf16.mxu0 %v1550_v0 }
 0x18d   : > { %v448_v19 = vpop.f32.mrb[0].mxu0 }
 0x18e   : > { %v449_v20 = vadd.f32 %v1032_v18, %v448_v19  ;;  %v1115_v21 = vpop.f32.mrb[1].mxu0 }
 0x18f   : > { %v451_v22 = vpop.f32.mrb[2].mxu0 }
 0x190   : > { %v454_v23 = vmax.f32 %v449_v20, 0.0  ;;  %v1116_v24 = vpop.f32.mrb[3].mxu0 }
 0x192   : > { %v456_v25 = vpack.c.bf16 %v454_v23, %v454_v23 }
 0x194   : > { %1134 = vmatmul.mubr.bf16.vlgmr.msra.gmra.mrb[0].mxu1 %v456_v25 }
 0x195   : > { %1173 = vmatprep.mubr.msk.bf16.mxu1 %vm1551_vm0, %v1550_v0  ;;  %1158 = vmatpush3.bf16.msra.mxu1 %v1308_v28 }
 0x196   : > { %1159 = vmatprep.subr.bf16.mxu1 %v1550_v0 }
 0x199   : > { %1160 = vmatpush3.bf16.msra.mxu1 %v1309_v29 }
 0x19a   : > { %1161 = vmatprep.subr.bf16.mxu1 %v1550_v0 }
 0x19d   : > { %1162 = vmatpush3.bf16.msra.mxu1 %v1310_v30 }
 0x19e   : > { %1163 = vmatprep.subr.bf16.mxu1 %v1550_v0 }
 0x1a1   : > { %1164 = vmatpush3.bf16.msra.mxu1 %v1311_v31 }
 0x1a2   : > { %1165 = vmatprep.subr.bf16.mxu1 %v1550_v0 }
 0x1a5   : > { %1166 = vmatpush3.bf16.msra.mxu1 %v1312_v32 }
 0x1a6   : > { %1167 = vmatprep.subr.bf16.mxu1 %v1550_v0 }
 0x1a9   : > { %1168 = vmatpush3.bf16.msra.mxu1 %v1313_v33 }
 0x1aa   : > { %1169 = vmatprep.subr.bf16.mxu1 %v1550_v0 }
 0x1ad   : > { %1170 = vmatpush3.bf16.msra.mxu1 %v1314_v42 }
 0x1ae   : > { %1171 = vmatprep.subr.bf16.mxu1 %v1550_v0 }
 0x1b1   : > { %1172 = vmatpush3.bf16.msra.mxu1 %v1315_v43 }
 0x267   : > { %v559_v35 = vpop.f32.mrb[0].mxu1 }
 0x268   : > { %v560_v36 = vadd.f32 %v1035_v34, %v559_v35  ;;  %v1135_v37 = vpop.f32.mrb[1].mxu1 }
 0x269   : > { %v562_v38 = vpop.f32.mrb[2].mxu1 }
 0x26a   : > { %v565_v39 = vmax.f32 %v560_v36, 0.0  ;;  %v1136_v40 = vpop.f32.mrb[3].mxu1 }
 0x26c   : > { %v567_v41 = vpack.c.bf16 %v565_v39, %v565_v39 }
 0x26e   : > { %1154 = vmatmul.mubr.bf16.vlgmr.msra.gmra.mrb[4].mxu0 %v567_v41 }
 0x26f   : > { %1193 = vmatprep.mubr.msk.bf16.mxu0 %vm1551_vm0, %v1550_v0  ;;  %1178 = vmatpush3.bf16.msra.mxu0 %v1316_v44 }
 0x270   : > { %1179 = vmatprep.subr.bf16.mxu0 %v1550_v0 }
 0x273   : > { %1180 = vmatpush3.bf16.msra.mxu0 %v1317_v45 }
 0x274   : > { %1181 = vmatprep.subr.bf16.mxu0 %v1550_v0 }
 0x277   : > { %1182 = vmatpush3.bf16.msra.mxu0 %v1318_v46 }
 0x278   : > { %1183 = vmatprep.subr.bf16.mxu0 %v1550_v0 }
 0x27b   : > { %1184 = vmatpush3.bf16.msra.mxu0 %v1319_v47 }
 0x27c   : > { %1185 = vmatprep.subr.bf16.mxu0 %v1550_v0 }
 0x27f   : > { %1186 = vmatpush3.bf16.msra.mxu0 %v1320_v48 }
 0x280   : > { %1187 = vmatprep.subr.bf16.mxu0 %v1550_v0 }
 0x283   : > { %1188 = vmatpush3.bf16.msra.mxu0 %v1321_v49 }
 0x284   : > { %1189 = vmatprep.subr.bf16.mxu0 %v1550_v0 }
 0x287   : > { %1190 = vmatpush3.bf16.msra.mxu0 %v1322_v58 }
 0x288   : > { %1191 = vmatprep.subr.bf16.mxu0 %v1550_v0  ;;  %v1062_v0 = vld [vmem:[%s1928_s7] ss:$0 sm:$0xff] }
 0x28b   : > { %1192 = vmatpush3.bf16.msra.mxu0 %v1323_v59 }
 0x341   : > { %v670_v51 = vpop.f32.mrb[4].mxu0 }
 0x342   : > { %v671_v52 = vadd.f32 %v1044_v50, %v670_v51  ;;  %v1155_v53 = vpop.f32.mrb[5].mxu0 }
 0x343   : > { %v673_v54 = vpop.f32.mrb[6].mxu0 }
 0x344   : > { %v676_v55 = vmax.f32 %v671_v52, 0.0  ;;  %v1156_v56 = vpop.f32.mrb[7].mxu0 }
 0x346   : > { %v678_v57 = vpack.c.bf16 %v676_v55, %v676_v55 }
 0x348   : > { %1174 = vmatmul.mubr.bf16.vlgmr.msra.gmra.mrb[4].mxu1 %v678_v57 }
 0x41b   : > { %v781_v61 = vpop.f32.mrb[4].mxu1 }
 0x41c   : > { %v782_v62 = vadd.f32 %v1053_v60, %v781_v61  ;;  %v1175_v63 = vpop.f32.mrb[5].mxu1 }
 0x41d   : > { %v784_v1 = vpop.f32.mrb[6].mxu1 }
 0x41e   : > { %v787_v2 = vmax.f32 %v782_v62, 0.0  ;;  %v1176_v3 = vpop.f32.mrb[7].mxu1 }
 0x420   : > { %v788_v4 = vpack.c.bf16 %v787_v2, %v787_v2 }
 0x422   : > { %1194 = vmatmul.mubr.bf16.vlgmr.msra.gmra.mrb[8].mxu0 %v788_v4 }
 0x4f5   : > { %v894_v5 = vpop.f32.mrb[8].mxu0 }
 0x4f6   : > { %v895_v6 = vadd.f32 %v1062_v0, %v894_v5  ;;  %v1195_v7 = vpop.f32.mrb[9].mxu0 }
 0x4f7   : > { %v897_v8 = vpop.f32.mrb[10].mxu0 }
 0x4f8   : > { %900 = vst [vmem:[%s393_s21] sm:$0xff] %v895_v6  ;;  %v1196_v9 = vpop.f32.mrb[11].mxu0 }
 0x4f9 PF: > { %p21_p6 = scmp.ge.s32.totalorder %s1768_s15, 4   ;;  %s1947_s27 = smov %s1532_s28 }
 0x4fa   : > { %s1948_s28 = smov %s1536_s29  ;;  %s1949_s29 = smov %s1779_s16 }
 0x4fb   : > { %s1950_s30 = smov %s1768_s15  ;;  %23 = sbr.rel (!%p21_p6) target bundleno = 8 (0x8), region = 112 }
 0x502   :  { %920 = vsyncpa [#allocation3], 1 }
 0x503   :  { %922 = vsyncpa [#allocation3 + $0x1], 1 }
 0x504   :  { %923 = vsyncpa [#allocation5], 1 }
 0x505   :  { %924 = vsyncpa [#allocation8], 1 }
 0x506   :  { %925 = vsyncpa [#allocation11], 1 }

</bundles_post_ra>
